<compile_context>
chip_gen: v7x
topology: tpu7x:2x2x1
jax: 0.10.0
libtpu: 0.0.40
codegen_flags: <defaults>
</compile_context>

<pallas_src>
import numpy as np

import jax
import jax.numpy as jnp
from jax.experimental import pallas as pl
from jax.experimental.pallas import tpu as pltpu


# --------------------------------------------------------------------------- #
# Kernel
# --------------------------------------------------------------------------- #
def _valid_interval_pred_kernel(av_ref, x_ref, m_ref, o_ref):
    """One lane-dense row tile of the concatenated batch.

    av_ref : SMEM int32[num_tiles] -- 1 iff this row tile overlaps any valid
             interval (precomputed on host).
    x_ref  : VMEM (C, TILE_N) logits (classes on sublanes, rows on lanes).
    m_ref  : VMEM (1, TILE_N) bf16 per-row validity mask (1.0 inside a valid
             interval, 0.0 outside / row padding).
    o_ref  : VMEM (1, TILE_N) float32 predictions.
    """
    c, tile_n = x_ref.shape
    tile_valid = av_ref[pl.program_id(0)]

    @pl.when(tile_valid == 0)
    def _():
        # Tile lies completely outside every [start, end): skip the argmax.
        o_ref[...] = jnp.zeros_like(o_ref)

    @pl.when(tile_valid != 0)
    def _():
        # argmax over classes directly on the logits (softmax is monotonic, so
        # softmax-then-argmax == argmax). First maximal index, like torch.argmax.
        x = x_ref[...]                                            # (C, TILE_N)
        if not jnp.issubdtype(x_ref.dtype, jnp.floating):
            x = x.astype(jnp.float32)
        cls = jax.lax.broadcasted_iota(jnp.int32, (c, tile_n), 0)
        mx = jnp.max(x, axis=0, keepdims=True)                    # sublane reduce
        amax = jnp.min(jnp.where(x == mx, cls, c), axis=0, keepdims=True)

        # Zero out rows outside the union of valid intervals (mask is 0/1).
        o_ref[...] = amax.astype(jnp.float32) * m_ref[...].astype(jnp.float32)


# --------------------------------------------------------------------------- #
# Wrapper
# --------------------------------------------------------------------------- #
def _norm_interval(s, e, n):
    """Python-slice semantics for [s:e] on a length-n axis."""
    s = int(s)
    e = int(e)
    if s < 0:
        s += n
    if e < 0:
        e += n
    s = max(0, min(s, n))
    e = max(0, min(e, n))
    return s, e


def _pick_tile_n(n_total, c, itemsize, target_block_bytes=8 * 1024 * 1024):
    """Lane-dense row tile (multiple of 128). ~8 MiB input blocks amortize the
    ~0.35 us per-grid-step overhead to <5% on every generation; double-buffered
    (16 MiB) they stay inside the 32 MiB scoped-VMEM limit (v5e/v6e/v7x)."""
    n_lanes = max(128, ((n_total + 127) // 128) * 128)
    t = target_block_bytes // max(1, c * itemsize)
    t = max(128, (t // 128) * 128)
    t = min(t, n_lanes)
    # v7x megacore: if the whole batch fits in one tile but there is enough
    # work, split into >=2 tiles so the ("parallel",) axis load-balances
    # across both TensorCores.
    if t >= n_lanes and n_lanes >= 256:
        t = max(128, (((n_lanes + 1) // 2 + 127) // 128) * 128)
    return t


def valid_interval_multi_pred(output, tile_n=None):
    """Pallas equivalent of ValidIntervalMultiPred.forward.

    output = (data, valid_intervals)
      data:            list of (N_i, C_i) arrays of logits
      valid_intervals: list of (start, end) pairs
    returns: list of (N_i,) float32 arrays
    """
    data, valid_intervals = output
    if len(data) == 0:
        return []

    dtype = jnp.result_type(*[d.dtype for d in data])
    c_max = max(int(d.shape[1]) for d in data)
    if jnp.issubdtype(dtype, jnp.floating):
        pad_val = float(jnp.finfo(dtype).min)
    else:
        pad_val = int(jnp.iinfo(dtype).min)

    # ---- assemble contiguous (N_total, C_max) pieces + global intervals ---- #
    pieces, offsets, gstarts, gends = [], [], [], []
    off = 0
    for d, itv in zip(data, valid_intervals):
        n_i, c_i = int(d.shape[0]), int(d.shape[1])
        d = d.astype(dtype)
        if c_i < c_max:
            d = jnp.pad(d, ((0, 0), (0, c_max - c_i)), constant_values=pad_val)
        pieces.append(d)
        s, e = _norm_interval(itv[0], itv[1], n_i)
        offsets.append(off)
        gstarts.append(off + s)
        gends.append(off + e)
        off += n_i
    n_total = off

    itemsize = jnp.dtype(dtype).itemsize
    if tile_n is None:
        tile_n = _pick_tile_n(n_total, c_max, itemsize)
    n_pad = ((n_total + tile_n - 1) // tile_n) * tile_n
    num_tiles = n_pad // tile_n

    # Row padding is appended as a zeros piece (single concat, no post-pad),
    # then ONE transpose to the (C_max, N_pad) kernel layout.
    # TODO(synk): if the upstream producer can emit (C, N) directly (or XLA
    # input fusion is enabled for this call), this transpose disappears.
    if n_pad > n_total:
        pieces.append(jnp.zeros((n_pad - n_total, c_max), dtype=dtype))
    x = jnp.transpose(jnp.concatenate(pieces, axis=0))            # (C_max, N_pad)

    # ---- host-side (numpy) precompute: per-tile flag + per-row mask ---- #
    av_np = np.zeros((num_tiles,), dtype=np.int32)
    mask_np = np.zeros((1, n_pad), dtype=np.float32)
    for s, e in zip(gstarts, gends):
        if e > s:
            av_np[s // tile_n:(e - 1) // tile_n + 1] = 1
            mask_np[0, s:e] = 1.0
    av = jnp.asarray(av_np)
    mask = jnp.asarray(mask_np, dtype=jnp.bfloat16)

    out = pl.pallas_call(
        _valid_interval_pred_kernel,
        out_shape=jax.ShapeDtypeStruct((1, n_pad), jnp.float32),
        grid_spec=pltpu.PrefetchScalarGridSpec(
            num_scalar_prefetch=1,
            grid=(num_tiles,),
            in_specs=[
                pl.BlockSpec((c_max, tile_n), lambda i, av_ref: (0, i)),
                pl.BlockSpec((1, tile_n), lambda i, av_ref: (0, i)),
            ],
            out_specs=pl.BlockSpec((1, tile_n), lambda i, av_ref: (0, i)),
        ),
        compiler_params=pltpu.CompilerParams(
            dimension_semantics=("parallel",),            # megacore sharding on v7x
            vmem_limit_bytes=32 * 1024 * 1024,            # 2 x 8 MiB blocks + slack
        ),
    )(av, x, mask)

    flat = out[0]                                         # (n_pad,) float32
    return [flat[o:o + int(d.shape[0])] for o, d in zip(offsets, data)]


# --------------------------------------------------------------------------- #
# Pure-JAX reference + self-test
# --------------------------------------------------------------------------- #
def _reference(output):
    data, valid_intervals = output
    preds = []
    for d, itv in zip(data, valid_intervals):
        n = d.shape[0]
        s, e = _norm_interval(itv[0], itv[1], n)
        p = jax.nn.softmax(d.astype(jnp.float32), axis=1)
        am = jnp.argmax(p, axis=1).astype(jnp.float32)
        row = jnp.arange(n)
        preds.append(jnp.where((row >= s) & (row < e), am, 0.0))
    return preds


if __name__ == "__main__":
    key = jax.random.PRNGKey(0)
    # Small, deterministic synthetic inputs: 3 ragged samples, 8 classes.
    shapes = [(16, 8), (8, 8), (24, 8)]
    intervals = [(2, 10), (0, 8), (5, 20)]

    data = []
    for shp in shapes:
        key, sub = jax.random.split(key)
        data.append(jax.random.normal(sub, shp, dtype=jnp.float32))

    preds = valid_interval_multi_pred((data, intervals))
    preds = [jax.block_until_ready(p) for p in preds]

    refs = _reference((data, intervals))
    for p, r in zip(preds, refs):
        assert p.shape == r.shape and p.dtype == jnp.float32
        assert jnp.allclose(p, r), (p, r)

    print("KERNEL_OK")
</pallas_src>

<mosaic_0001>
module attributes {stable_mosaic.version = 11 : i64} {
  func.func @_valid_interval_pred_kernel(%arg0: i32, %arg1: memref<1xi32, #tpu.memory_space<smem>>, %arg2: memref<8x128xf32, #tpu.memory_space<vmem>>, %arg3: memref<1x128xbf16, #tpu.memory_space<vmem>>, %arg4: memref<1x128xf32, #tpu.memory_space<vmem>>) attributes {dimension_semantics = [#tpu.dimension_semantics<parallel>], iteration_bounds = array<i64: 1>, scalar_prefetch = 1 : i64, scratch_operands = 0 : i64, tpu.core_type = #tpu.core_type<tc>, window_params = [{transform_indices = @transform_0, window_bounds = array<i64: 8, 128>}, {transform_indices = @transform_1, window_bounds = array<i64: 1, 128>}, {transform_indices = @transform_2, window_bounds = array<i64: 1, 128>}]} {
    %0 = arith.index_cast %arg0 : i32 to index
    %1 = memref.load %arg1[%0] : memref<1xi32, #tpu.memory_space<smem>>
    %c0_i32 = arith.constant 0 : i32
    %2 = arith.cmpi eq, %1, %c0_i32 : i32
    %3 = arith.extui %2 : i1 to i32
    %c0_i32_0 = arith.constant 0 : i32
    %4 = arith.cmpi ne, %3, %c0_i32_0 : i32
    scf.if %4 {
      %cst = arith.constant 0.000000e+00 : f32
      %8 = vector.broadcast %cst : f32 to vector<1x128xf32>
      %c0 = arith.constant 0 : index
      %c0_3 = arith.constant 0 : index
      %9 = vector.load %arg4[%c0, %c0_3] : memref<1x128xf32, #tpu.memory_space<vmem>>, vector<1x128xf32>
      tpu.vector_store %arg4[%c0, %c0_3], %8 {strides = array<i32>} : memref<1x128xf32, #tpu.memory_space<vmem>>, vector<1x128xf32>,
    } else {
    }
    %c0_i32_1 = arith.constant 0 : i32
    %5 = arith.cmpi ne, %1, %c0_i32_1 : i32
    %6 = arith.extui %5 : i1 to i32
    %c0_i32_2 = arith.constant 0 : i32
    %7 = arith.cmpi ne, %6, %c0_i32_2 : i32
    scf.if %7 {
      %c0 = arith.constant 0 : index
      %c0_3 = arith.constant 0 : index
      %8 = vector.load %arg2[%c0, %c0_3] : memref<8x128xf32, #tpu.memory_space<vmem>>, vector<8x128xf32>
      %9 = tpu.iota {dimensions = array<i32: 0>} : vector<8x128xi32>
      %cst = arith.constant dense<0xFF800000> : vector<128xf32>
      %10 = vector.multi_reduction <maximumf>, %8, %cst [0] : vector<8x128xf32> to vector<128xf32>
      %11 = vector.shape_cast %10 : vector<128xf32> to vector<1x128xf32>
      %12 = vector.broadcast %11 : vector<1x128xf32> to vector<8x128xf32>
      %13 = arith.cmpf oeq, %8, %12 : vector<8x128xf32>
      %c8_i32 = arith.constant 8 : i32
      %14 = vector.broadcast %c8_i32 : i32 to vector<8x128xi32>
      %15 = arith.select %13, %9, %14 : vector<8x128xi1>, vector<8x128xi32>
      %cst_4 = arith.constant dense<2147483647> : vector<128xi32>
      %16 = vector.multi_reduction <minsi>, %15, %cst_4 [0] : vector<8x128xi32> to vector<128xi32>
      %17 = vector.shape_cast %16 : vector<128xi32> to vector<1x128xi32>
      %18 = arith.sitofp %17 : vector<1x128xi32> to vector<1x128xf32>
      %c0_5 = arith.constant 0 : index
      %c0_6 = arith.constant 0 : index
      %19 = vector.load %arg3[%c0_5, %c0_6] : memref<1x128xbf16, #tpu.memory_space<vmem>>, vector<1x128xbf16>
      %20 = arith.extf %19 : vector<1x128xbf16> to vector<1x128xf32>
      %21 = arith.mulf %18, %20 : vector<1x128xf32>
      %c0_7 = arith.constant 0 : index
      %c0_8 = arith.constant 0 : index
      %22 = vector.load %arg4[%c0_7, %c0_8] : memref<1x128xf32, #tpu.memory_space<vmem>>, vector<1x128xf32>
      tpu.vector_store %arg4[%c0_7, %c0_8], %21 {strides = array<i32>} : memref<1x128xf32, #tpu.memory_space<vmem>>, vector<1x128xf32>,
    } else {
    }
    return
  }
  func.func @transform_0(%arg0: i32, %arg1: memref<1xi32, #tpu.memory_space<smem>>) -> (i32, i32) {
    %c0_i32 = arith.constant 0 : i32
    %c0_i32_0 = arith.constant 0 : i32
    return %c0_i32, %arg0 : i32, i32
  }
  func.func @transform_1(%arg0: i32, %arg1: memref<1xi32, #tpu.memory_space<smem>>) -> (i32, i32) {
    %c0_i32 = arith.constant 0 : i32
    %c0_i32_0 = arith.constant 0 : i32
    return %c0_i32, %arg0 : i32, i32
  }
  func.func @transform_2(%arg0: i32, %arg1: memref<1xi32, #tpu.memory_space<smem>>) -> (i32, i32) {
    %c0_i32 = arith.constant 0 : i32
    %c0_i32_0 = arith.constant 0 : i32
    return %c0_i32, %arg0 : i32, i32
  }
}

</mosaic_0001>

<bundles_post_ra>
// kernel: tpu_custom_call.1
= control target key start
LH: loop header
LB: loop body
LE: loop exit
PB: predicated region body
PF: predicated region fallthrough
CT: control target
= control target key end

     0   :  { %9 = vsyncpa [#allocation5], 0  ;;  %s185_s0 = inlined_call_operand.<no memory space> [shape: s32[1], index: 0, kind: input, shape index: {}]   ;;  %s186_s1 = inlined_call_operand.hbm [shape: f32[8,128], index: 1, kind: input, shape index: {}]   ;;  %s187_s2 = inlined_call_operand.vmem [shape: bf16[1,128], index: 2, kind: input, shape index: {}]   ;;  %s188_s3 = inlined_call_operand.hbm [shape: f32[1,128], index: 3, kind: output, shape index: {}]  }
   0x1   :  { %10 = vsyncpa [#allocation6], 0  ;;  %s129_s12 = smov [#allocation4]   ;;  %s81_s16 = scalar_lea.hbm %s186_s1, 128 }
   0x2   :  { %s17_s13 = sshll.u32 %s129_s12, 4  ;;  %p82_p0 = scmp.ne.s32.totalorder %s186_s1, %s81_s16  ;;  %s18_s13 = int_to_ptr.vmem [resolvable:$true] %s17_s13 }
   0x3   :  { %p85_p1 = scmp.lt.u32.totalorder %s81_s16, %s186_s1 }
   0x5   :  { %p87_p2 = pnand %p85_p1, %p82_p0 }
   0x7   :  { %90 = shalt.err (!%p87_p2)
}
   0x8   :  { %s91_s21 = scalar_lea.vmem %s18_s13, 128  ;;  %p96_p4 = scmp.lt.s32.totalorder %s18_s13, %s18_s13 }
   0x9   :  { %p92_p3 = scmp.ne.s32.totalorder %s18_s13, %s91_s21  ;;  %p97_p5 = scmp.lt.s32.totalorder %s91_s21, %s91_s21 }
   0xb   :  { %p98_p6 = por %p97_p5, %p96_p4 }
   0xd   :  { %p99_p7 = pnand %p98_p6, %p92_p3 }
   0xf   :  { %102 = shalt.err (!%p99_p7)
}
  0x10   :  { %20 = dma.hbm_to_vmem [thread:$0]  %s186_s1, 128, %s18_s13, [#allocation5]  }
  0x11   :  { %125 = dma.done.wait [#allocation5], 128  }
  0x12   :  { %126 = vsyncadd [#allocation5], 4294967168  ;;  %p76_p8 = scmp.ne.s32.totalorder %s185_s0, 0 }
  0x13   :  { %v130_v0 = vmov (!%p76_p8), 0.0  }
  0x14   :  { %30 = sbr.rel (%p76_p8) target bundleno = 27 (0x1b), region = 17  ;;  %31 = vst [vmem:[#allocation7] sm:$0x1] (!%p76_p8), %v130_v0 }
  0x1b PF:  { %p77_p9 = scmp.eq.s32.totalorder %s185_s0, 0 }
  0x1c   :  { %v36_v1 = vld [vmem:[#allocation4] sm:$0xff] (!%p77_p9)  ;;  %v37_v5 = vlaneseq (!%p77_p9) }
  0x1d   :  { %35 = sbr.rel (%p77_p9) target bundleno = 60 (0x3c), region = 21  ;;  %v39_v2 = vrot.slane (!%p77_p9), %v36_v1, 4  ;;  %v57_v15 = vld [vmem:[%s187_s2] sm:$0x1] (!%p77_p9) }
  0x1e   :  { %v38_v8 = vshrl.u32 (!%p77_p9), %v37_v5, 7  ;;  %v58_v17 = vunpack.c.l.bf16 (!%p77_p9), %v57_v15 }
  0x1f   :  { %v40_v3 = vmax.f32 (!%p77_p9), %v36_v1, %v39_v2 }
  0x21   :  { %v41_v4 = vrot.slane (!%p77_p9), %v40_v3, 2 }
  0x23   :  { %v42_v6 = vmax.f32 (!%p77_p9), %v40_v3, %v41_v4 }
  0x25   :  { %v43_v7 = vrot.slane %v42_v6, 1 }
  0x27   :  { %v44_v9 = vmax.f32 %v42_v6, %v43_v7 }
  0x29   :  { %vm45_vm0 = vcmp.eq.f32.partialorder %v36_v1, %v44_v9 }
  0x2a   :  { %v46_v10 = vsel %vm45_vm0, %v38_v8, 8 }
  0x2b   :  { %v47_v11 = vrot.slane %v46_v10, 4 }
  0x2d   :  { %vm48_vm1 = vcmp.lt.s32.totalorder %v46_v10, %v47_v11 }
  0x2e   :  { %v49_v12 = vsel %vm48_vm1, %v46_v10, %v47_v11 }
  0x2f   :  { %v50_v13 = vrot.slane %v49_v12, 2 }
  0x31   :  { %vm51_vm2 = vcmp.lt.s32.totalorder %v49_v12, %v50_v13 }
  0x32   :  { %v52_v14 = vsel %vm51_vm2, %v49_v12, %v50_v13 }
  0x33   :  { %v53_v16 = vrot.slane %v52_v14, 1 }
  0x35   :  { %vm54_vm3 = vcmp.lt.s32.totalorder %v52_v14, %v53_v16 }
  0x36   :  { %v55_v18 = vsel %vm54_vm3, %v52_v14, %v53_v16 }
  0x37   :  { %v56_v19 = vcvt.s32.f32 %v55_v18 }
  0x39   :  { %v59_v20 = vmul.f32 %v58_v17, %v56_v19 }
  0x3b   :  { %60 = vst [vmem:[#allocation7] sm:$0x1] %v59_v20 }
  0x3c PF:  { %s131_s28 = smov [#allocation7]  }
  0x3d   :  { %s67_s29 = sshll.u32 %s131_s28, 4  ;;  %s68_s29 = int_to_ptr.vmem [resolvable:$true] %s67_s29 }
  0x3e   :  { %s103_s30 = scalar_lea.vmem %s68_s29, 16  ;;  %s107_s4 = scalar_lea.vmem %s68_s29, 32 }
  0x3f   :  { %p104_p10 = scmp.ne.s32.totalorder %s68_s29, %s103_s30  ;;  %p108_p11 = scmp.lt.s32.totalorder %s68_s29, %s68_s29 }
  0x40   :  { %p109_p12 = scmp.lt.s32.totalorder %s107_s4, %s103_s30 }
  0x42   :  { %p110_p13 = por %p109_p12, %p108_p11 }
  0x44   :  { %p111_p0 = pnand %p110_p13, %p104_p10 }
  0x46   :  { %114 = shalt.err (!%p111_p0)
}
  0x47   :  { %s115_s6 = scalar_lea.hbm %s188_s3, 16 }
  0x48   :  { %p116_p1 = scmp.ne.s32.totalorder %s188_s3, %s115_s6  ;;  %p119_p2 = scmp.lt.u32.totalorder %s115_s6, %s188_s3 }
  0x4a   :  { %p121_p3 = pnand %p119_p2, %p116_p1 }
  0x4c   :  { %124 = shalt.err (!%p121_p3)
}
  0x4d   :  { %70 = dma.vmem_to_hbm [thread:$0]  %s68_s29, 16, %s188_s3, [#allocation6]  }
  0x4e   :  { %127 = dma.done.wait [#allocation6], 16  }
  0x4f   :  { %128 = vsyncadd [#allocation6], 4294967280 }
  0x50   :  { %74 = vsyncpa [#allocation5], 1 }
  0x51   :  { %75 = vsyncpa [#allocation6], 1 }

</bundles_post_ra>
